<compile_context>
chip_gen: v5e
topology: v5e:2x2
jax: 0.10.0
libtpu: 0.0.40
codegen_flags: <defaults>
</compile_context>

<pallas_src>
import functools
import numpy as np
import jax
import jax.numpy as jnp
from jax.experimental import pallas as pl
from jax.experimental.pallas import tpu as pltpu


def _round_up(x, m):
    return (x + m - 1) // m * m


def _pool_project_kernel(x_ref, w1_ref, b1_ref, w2_ref, b2_ref, out_ref, *, d_in_pad):
    # x_ref: (tm, 2*D_in_pad) — row i holds frames (2i, 2i+1) concatenated on lanes.
    x = x_ref[...]
    # AvgPool1d(kernel=2, stride=2) as a lane-aligned split: pure VPU, no XLU.
    pooled = (x[:, :d_in_pad].astype(jnp.float32)
              + x[:, d_in_pad:].astype(jnp.float32)) * 0.5       # (tm, D_in_pad) f32
    # MultiModalProjector: Linear -> ReLU -> Linear, bf16 in / f32 accumulate (MXU).
    h = jnp.dot(pooled.astype(w1_ref.dtype), w1_ref[...],
                preferred_element_type=jnp.float32)               # (tm, H_pad)
    h = jnp.maximum(h + b1_ref[...], 0.0)
    y = jnp.dot(h.astype(w2_ref.dtype), w2_ref[...],
                preferred_element_type=jnp.float32)               # (tm, Dout_pad)
    y = y + b2_ref[...]
    out_ref[...] = y.astype(out_ref.dtype)


def prepare_audio_features_pallas(audio_features, w1, b1, w2, b2,
                                  *, tile_m=256, compute_dtype=jnp.bfloat16):
    """AvgPool1d(2,2) over time + MultiModalProjector, fused in one kernel.

    audio_features: [B, T, D_in]
    w1: [D_in, H], b1: [H], w2: [H, D_out], b2: [D_out]   (torch weights transposed)
    returns: [B, T//2, D_out] float32
    """
    B, T, D_in = audio_features.shape
    assert T % 2 == 0, "AvgPool1d(2,2) with padding=0 requires even T"
    H = w1.shape[1]
    D_out = w2.shape[1]

    # Fold batch & pooled-time into one tall M dimension.
    M = B * (T // 2)
    tm = min(tile_m, max(8, _round_up(M, 8)))
    M_pad = _round_up(M, tm)
    Din_pad = _round_up(D_in, 128)
    H_pad = _round_up(H, 128)
    Dout_pad = _round_up(D_out, 128)

    # (B, T, D_in) -> (M, 2, D_in) -> pad lanes -> (M, 2*D_in_pad):
    # frame pair (2i, 2i+1) sits side-by-side on lanes, each half 128-aligned.
    x2 = audio_features.reshape(M, 2, D_in).astype(compute_dtype)
    if Din_pad != D_in:
        x2 = jnp.pad(x2, ((0, 0), (0, 0), (0, Din_pad - D_in)))
    x2 = x2.reshape(M, 2 * Din_pad)
    if M_pad != M:
        x2 = jnp.pad(x2, ((0, M_pad - M), (0, 0)))

    # Pad weight dims to multiples of 128 so the MXU / stores see lane-dense tiles.
    w1p = jnp.pad(w1, ((0, Din_pad - D_in), (0, H_pad - H))).astype(compute_dtype)
    b1p = jnp.pad(b1, (0, H_pad - H)).reshape(1, H_pad).astype(jnp.float32)
    w2p = jnp.pad(w2, ((0, H_pad - H), (0, Dout_pad - D_out))).astype(compute_dtype)
    b2p = jnp.pad(b2, (0, Dout_pad - D_out)).reshape(1, Dout_pad).astype(jnp.float32)

    grid = (M_pad // tm,)

    flops = (2 * M_pad * Din_pad * H_pad          # linear1
             + 2 * M_pad * H_pad * Dout_pad       # linear2
             + 2 * M_pad * Din_pad)               # pooling
    bytes_accessed = (M_pad * 2 * Din_pad * 2                     # x (bf16)
                      + Din_pad * H_pad * 2 + H_pad * Dout_pad * 2  # weights (bf16)
                      + (H_pad + Dout_pad) * 4                    # biases (f32)
                      + M_pad * Dout_pad * 4)                     # output (f32)

    out = pl.pallas_call(
        functools.partial(_pool_project_kernel, d_in_pad=Din_pad),
        out_shape=jax.ShapeDtypeStruct((M_pad, Dout_pad), jnp.float32),
        grid_spec=pl.GridSpec(
            grid=grid,
            in_specs=[
                pl.BlockSpec((tm, 2 * Din_pad), lambda m: (m, 0)),
                pl.BlockSpec((Din_pad, H_pad), lambda m: (0, 0)),    # resident
                pl.BlockSpec((1, H_pad), lambda m: (0, 0)),          # resident
                pl.BlockSpec((H_pad, Dout_pad), lambda m: (0, 0)),   # resident
                pl.BlockSpec((1, Dout_pad), lambda m: (0, 0)),       # resident
            ],
            out_specs=pl.BlockSpec((tm, Dout_pad), lambda m: (m, 0)),
        ),
        compiler_params=pltpu.CompilerParams(
            dimension_semantics=("parallel",),
            # Budgeted for v7x (64 MiB physical VMEM); well below v5e/v6e's 128 MiB.
            vmem_limit_bytes=48 * 1024 * 1024,
        ),
        cost_estimate=pl.CostEstimate(flops=flops, transcendentals=0,
                                      bytes_accessed=bytes_accessed),
    )(x2, w1p, b1p, w2p, b2p)

    return out[:M, :D_out].reshape(B, T // 2, D_out)


def _splice_audio_span(embedded_input, audio_embeddings, input_ids,
                       audio_token_id, audio_end_token_id):
    """Traced equivalent of the PyTorch per-batch span-replacement loop."""
    B, S, D = embedded_input.shape
    Ta = audio_embeddings.shape[1]

    is_start = input_ids == audio_token_id                    # (B, S)
    is_end = input_ids == audio_end_token_id
    start = jnp.argmax(is_start, axis=1)                      # first <|audio|>
    end = jnp.argmax(is_end, axis=1)                          # first <|endofaudio|>
    has_span = jnp.any(is_start, axis=1) & jnp.any(is_end, axis=1)
    audio_len = jnp.clip(end - start - 1, 0, Ta)              # (B,)

    pos = jnp.arange(S)[None, :]                              # (1, S)
    rel = pos - (start[:, None] + 1)                          # (B, S)
    mask = (rel >= 0) & (rel < audio_len[:, None]) & has_span[:, None]
    rel_c = jnp.clip(rel, 0, Ta - 1)
    gathered = jnp.take_along_axis(audio_embeddings, rel_c[:, :, None], axis=1)
    return jnp.where(mask[:, :, None], gathered.astype(embedded_input.dtype),
                     embedded_input)


@functools.partial(jax.jit, static_argnames=("audio_token_id", "audio_end_token_id"))
def speech_to_text_forward(audio_features, input_ids, embed_table, params,
                           audio_token_id, audio_end_token_id):
    """Mirrors SpeechToTextModel.forward up to (but not including) the LM call.

    Returns (inputs_embeds, audio_embeddings).
    """
    # --- hot path: pooling + projection, fused Pallas kernel ---
    audio_embeddings = prepare_audio_features_pallas(
        audio_features, params["w1"], params["b1"], params["w2"], params["b2"])

    # --- glue: token-embedding lookup + audio-span replacement (traced) ---
    embedded_input = embed_table[input_ids]                   # (B, S, D_out)
    inputs_embeds = _splice_audio_span(
        embedded_input, audio_embeddings, input_ids,
        audio_token_id, audio_end_token_id)

    # TODO(synk): pretrained causal LM forward on `inputs_embeds` is not
    # reproducible without the GPT-2 checkpoint; stop here.
    return inputs_embeds, audio_embeddings


def kaiming_normal_fan_out(key, out_dim, in_dim):
    # torch kaiming_normal_(mode='fan_out', nonlinearity='relu'):
    # std = sqrt(2 / fan_out), weight shape [out_dim, in_dim].
    std = np.sqrt(2.0 / out_dim)
    return jax.random.normal(key, (out_dim, in_dim), dtype=jnp.float32) * std


if __name__ == "__main__":
    # Small, deterministic shapes.
    B, T, D_in = 2, 16, 256          # audio encoder output: [B, T, D_audio]
    D_out = 128                      # lm hidden size
    H = D_out                        # projection_hidden_size=None -> hidden=out
    S = 12                           # text sequence length
    VOCAB = 512
    AUDIO_TOKEN_ID = 500
    AUDIO_END_TOKEN_ID = 501

    key = jax.random.PRNGKey(0)
    k_feat, k_w1, k_w2, k_emb, k_ids = jax.random.split(key, 5)

    audio_features = jax.random.normal(k_feat, (B, T, D_in), dtype=jnp.float32)

    # MultiModalProjector weights (Kaiming fan_out, zero bias), stored [in, out].
    w1_t = kaiming_normal_fan_out(k_w1, H, D_in)     # torch layout [H, D_in]
    w2_t = kaiming_normal_fan_out(k_w2, D_out, H)    # torch layout [D_out, H]
    params = {
        "w1": jnp.transpose(w1_t),                   # [D_in, H]
        "b1": jnp.zeros((H,), jnp.float32),
        "w2": jnp.transpose(w2_t),                   # [H, D_out]
        "b2": jnp.zeros((D_out,), jnp.float32),
    }

    # Deterministic token embedding table (stand-in for lm.transformer.wte).
    embed_table = jax.random.normal(k_emb, (VOCAB, D_out), dtype=jnp.float32) * 0.02

    # input_ids with an audio span: <|audio|> at pos 1, <|endofaudio|> at pos 10.
    ids = jax.random.randint(k_ids, (B, S), 0, 400)
    ids = ids.at[:, 1].set(AUDIO_TOKEN_ID)
    ids = ids.at[:, 10].set(AUDIO_END_TOKEN_ID)

    inputs_embeds, audio_emb = speech_to_text_forward(
        audio_features, ids, embed_table, params,
        AUDIO_TOKEN_ID, AUDIO_END_TOKEN_ID)
    jax.block_until_ready(inputs_embeds)

    # --- reference check of the Pallas hot path (f32 reference; kernel uses
    #     bf16 inputs with f32 accumulation, matching the bf16 torch module) ---
    pooled_ref = audio_features.reshape(B, T // 2, 2, D_in).mean(axis=2)
    h_ref = jnp.maximum(pooled_ref @ params["w1"] + params["b1"], 0.0)
    proj_ref = h_ref @ params["w2"] + params["b2"]
    np.testing.assert_allclose(np.asarray(audio_emb), np.asarray(proj_ref),
                               rtol=5e-2, atol=5e-2)

    # --- reference check of the traced span replacement ---
    emb_np = np.asarray(embed_table)[np.asarray(ids)]
    audio_np = np.asarray(audio_emb)
    ref_embeds = emb_np.copy()
    for b in range(B):
        start_pos, end_pos = 1, 10
        alen = min(end_pos - start_pos - 1, audio_np.shape[1])
        ref_embeds[b, start_pos + 1:start_pos + 1 + alen] = audio_np[b, :alen]
    np.testing.assert_allclose(np.asarray(inputs_embeds), ref_embeds,
                               rtol=1e-5, atol=1e-5)

    print("KERNEL_OK")
</pallas_src>

<mosaic_0001>
module attributes {stable_mosaic.version = 11 : i64} {
  func.func @_pool_project_kernel(%arg0: i32, %arg1: memref<16x512xbf16, #tpu.memory_space<vmem>>, %arg2: memref<256x128xbf16, #tpu.memory_space<vmem>>, %arg3: memref<1x128xf32, #tpu.memory_space<vmem>>, %arg4: memref<128x128xbf16, #tpu.memory_space<vmem>>, %arg5: memref<1x128xf32, #tpu.memory_space<vmem>>, %arg6: memref<16x128xf32, #tpu.memory_space<vmem>>) attributes {dimension_semantics = [#tpu.dimension_semantics<parallel>], iteration_bounds = array<i64: 1>, scalar_prefetch = 0 : i64, scratch_operands = 0 : i64, tpu.core_type = #tpu.core_type<tc>, window_params = [{transform_indices = @transform_0, window_bounds = array<i64: 16, 512>}, {pipeline_mode = #tpu.pipeline_mode<synchronous>, transform_indices = @transform_1, window_bounds = array<i64: 256, 128>}, {pipeline_mode = #tpu.pipeline_mode<synchronous>, transform_indices = @transform_2, window_bounds = array<i64: 1, 128>}, {pipeline_mode = #tpu.pipeline_mode<synchronous>, transform_indices = @transform_3, window_bounds = array<i64: 128, 128>}, {pipeline_mode = #tpu.pipeline_mode<synchronous>, transform_indices = @transform_4, window_bounds = array<i64: 1, 128>}, {transform_indices = @transform_5, window_bounds = array<i64: 16, 128>}]} {
    %c0 = arith.constant 0 : index
    %c0_0 = arith.constant 0 : index
    %0 = vector.load %arg1[%c0, %c0_0] : memref<16x512xbf16, #tpu.memory_space<vmem>>, vector<16x512xbf16>
    %1 = vector.extract_strided_slice %0 {offsets = [0, 0], sizes = [16, 256], strides = [1, 1]} : vector<16x512xbf16> to vector<16x256xbf16>
    %2 = arith.extf %1 : vector<16x256xbf16> to vector<16x256xf32>
    %3 = vector.extract_strided_slice %0 {offsets = [0, 256], sizes = [16, 256], strides = [1, 1]} : vector<16x512xbf16> to vector<16x256xbf16>
    %4 = arith.extf %3 : vector<16x256xbf16> to vector<16x256xf32>
    %5 = arith.addf %2, %4 : vector<16x256xf32>
    %cst = arith.constant 5.000000e-01 : f32
    %6 = vector.broadcast %cst : f32 to vector<16x256xf32>
    %7 = arith.mulf %5, %6 : vector<16x256xf32>
    %8 = arith.truncf %7 : vector<16x256xf32> to vector<16x256xbf16>
    %c0_1 = arith.constant 0 : index
    %c0_2 = arith.constant 0 : index
    %9 = vector.load %arg2[%c0_1, %c0_2] : memref<256x128xbf16, #tpu.memory_space<vmem>>, vector<256x128xbf16>
    %cst_3 = arith.constant dense<0.000000e+00> : vector<16x128xf32>
    %10 = tpu.matmul %8, %9, %cst_3 {dimension_numbers = #tpu.dot_dimension_numbers<[1], [0], [0], [1], [0, 0, 1, 1], [], []>} : vector<16x256xbf16>, vector<256x128xbf16>, vector<16x128xf32> -> vector<16x128xf32>
    %c0_4 = arith.constant 0 : index
    %c0_5 = arith.constant 0 : index
    %11 = vector.load %arg3[%c0_4, %c0_5] : memref<1x128xf32, #tpu.memory_space<vmem>>, vector<1x128xf32>
    %12 = vector.broadcast %11 : vector<1x128xf32> to vector<16x128xf32>
    %13 = arith.addf %10, %12 : vector<16x128xf32>
    %cst_6 = arith.constant 0.000000e+00 : f32
    %14 = vector.broadcast %cst_6 : f32 to vector<16x128xf32>
    %15 = arith.maximumf %13, %14 : vector<16x128xf32>
    %16 = arith.truncf %15 : vector<16x128xf32> to vector<16x128xbf16>
    %c0_7 = arith.constant 0 : index
    %c0_8 = arith.constant 0 : index
    %17 = vector.load %arg4[%c0_7, %c0_8] : memref<128x128xbf16, #tpu.memory_space<vmem>>, vector<128x128xbf16>
    %cst_9 = arith.constant dense<0.000000e+00> : vector<16x128xf32>
    %18 = tpu.matmul %16, %17, %cst_9 {dimension_numbers = #tpu.dot_dimension_numbers<[1], [0], [0], [1], [0, 0, 1, 1], [], []>} : vector<16x128xbf16>, vector<128x128xbf16>, vector<16x128xf32> -> vector<16x128xf32>
    %c0_10 = arith.constant 0 : index
    %c0_11 = arith.constant 0 : index
    %19 = vector.load %arg5[%c0_10, %c0_11] : memref<1x128xf32, #tpu.memory_space<vmem>>, vector<1x128xf32>
    %20 = vector.broadcast %19 : vector<1x128xf32> to vector<16x128xf32>
    %21 = arith.addf %18, %20 : vector<16x128xf32>
    %c0_12 = arith.constant 0 : index
    %c0_13 = arith.constant 0 : index
    %22 = vector.load %arg6[%c0_12, %c0_13] : memref<16x128xf32, #tpu.memory_space<vmem>>, vector<16x128xf32>
    tpu.vector_store %arg6[%c0_12, %c0_13], %21 {strides = array<i32>} : memref<16x128xf32, #tpu.memory_space<vmem>>, vector<16x128xf32>,
    return
  }
  func.func @transform_0(%arg0: i32) -> (i32, i32) {
    %c0_i32 = arith.constant 0 : i32
    %c0_i32_0 = arith.constant 0 : i32
    return %arg0, %c0_i32 : i32, i32
  }
  func.func @transform_1(%arg0: i32) -> (i32, i32) {
    %c0_i32 = arith.constant 0 : i32
    %c0_i32_0 = arith.constant 0 : i32
    %c0_i32_1 = arith.constant 0 : i32
    return %c0_i32, %c0_i32_0 : i32, i32
  }
  func.func @transform_2(%arg0: i32) -> (i32, i32) {
    %c0_i32 = arith.constant 0 : i32
    %c0_i32_0 = arith.constant 0 : i32
    %c0_i32_1 = arith.constant 0 : i32
    return %c0_i32, %c0_i32_0 : i32, i32
  }
  func.func @transform_3(%arg0: i32) -> (i32, i32) {
    %c0_i32 = arith.constant 0 : i32
    %c0_i32_0 = arith.constant 0 : i32
    %c0_i32_1 = arith.constant 0 : i32
    return %c0_i32, %c0_i32_0 : i32, i32
  }
  func.func @transform_4(%arg0: i32) -> (i32, i32) {
    %c0_i32 = arith.constant 0 : i32
    %c0_i32_0 = arith.constant 0 : i32
    %c0_i32_1 = arith.constant 0 : i32
    return %c0_i32, %c0_i32_0 : i32, i32
  }
  func.func @transform_5(%arg0: i32) -> (i32, i32) {
    %c0_i32 = arith.constant 0 : i32
    %c0_i32_0 = arith.constant 0 : i32
    return %arg0, %c0_i32 : i32, i32
  }
}

</mosaic_0001>

<bundles_post_ra>
// kernel: speech_to_text_forward.1
= control target key start
LH: loop header
LB: loop body
LE: loop exit
PB: predicated region body
PF: predicated region fallthrough
CT: control target
= control target key end

     0   :  { %s541_s1 = inlined_call_operand.vmem [shape: bf16[256,128], index: 1, kind: input, shape index: {}]   ;;  %s542_s3 = inlined_call_operand.vmem [shape: bf16[128,128], index: 3, kind: input, shape index: {}]   ;;  %s543_s2 = inlined_call_operand.vmem [shape: f32[1,128], index: 2, kind: input, shape index: {}]   ;;  %s544_s0 = inlined_call_operand.vmem [shape: bf16[16,512], index: 0, kind: input, shape index: {}]   ;;  %s545_s4 = inlined_call_operand.vmem [shape: f32[1,128], index: 4, kind: input, shape index: {}]   ;;  %s546_s5 = inlined_call_operand.vmem [shape: f32[16,128], index: 5, kind: output, shape index: {}]  }
   0x1   :  { %v396_v0 = vld [vmem:[%s541_s1 + $0x38] sm:$0xff]  ;;  %v395_v2 = vld [vmem:[%s541_s1 + $0x30] sm:$0xff]  ;;  %v394_v4 = vld [vmem:[%s541_s1 + $0x28] sm:$0xff] }
   0x2   :  { %v404_v1 = vld [vmem:[%s541_s1 + $0x78] sm:$0xff]  ;;  %174 = vmatpush.bf16.msra.mxu0 %v396_v0  ;;  %v403_v3 = vld [vmem:[%s541_s1 + $0x70] sm:$0xff]  ;;  %v402_v5 = vld [vmem:[%s541_s1 + $0x68] sm:$0xff] }
   0x3   :  { %188 = vmatpush.bf16.msra.mxu1 %v404_v1  ;;  %v412_v6 = vld [vmem:[%s542_s3 + $0x38] sm:$0xff]  ;;  %v411_v7 = vld [vmem:[%s542_s3 + $0x30] sm:$0xff]  ;;  %v393_v8 = vld [vmem:[%s541_s1 + $0x20] sm:$0xff] }
   0x4   :  { %273 = vmatpush.bf16.msra.mxu2 %v412_v6  ;;  %v401_v9 = vld [vmem:[%s541_s1 + $0x60] sm:$0xff]  ;;  %v410_v10 = vld [vmem:[%s542_s3 + $0x28] sm:$0xff]  ;;  %v392_v11 = vld [vmem:[%s541_s1 + $0x18] sm:$0xff] }
   0x5   :  { %v20_v12 = vld [vmem:[%s544_s0] sm:$0xff]  ;;  %v21_v13 = vld [vmem:[%s544_s0 + $0x8] sm:$0xff]  ;;  %v400_v14 = vld [vmem:[%s541_s1 + $0x58] sm:$0xff] }
   0x6   :  { %175 = vmatpush.bf16.msra.mxu0 %v395_v2  ;;  %v22_v15 = vld [vmem:[%s544_s0 + $0x10] sm:$0xff]  ;;  %v23_v16 = vld [vmem:[%s544_s0 + $0x18] sm:$0xff]  ;;  %v24_v17 = vunpack.c.l.bf16 %v20_v12  ;;  %v28_v18 = vunpack.c.l.bf16 %v21_v13  ;;  %v25_v19 = vunpack.c.h.bf16 %v20_v12  ;;  %v29_v20 = vunpack.c.h.bf16 %v21_v13  ;;  %v409_v21 = vld [vmem:[%s542_s3 + $0x20] sm:$0xff] }
   0x7   :  { %189 = vmatpush.bf16.msra.mxu1 %v403_v3  ;;  %v26_v22 = vunpack.c.l.bf16 %v22_v15  ;;  %v30_v23 = vunpack.c.l.bf16 %v23_v16  ;;  %v27_v24 = vunpack.c.h.bf16 %v22_v15  ;;  %v31_v25 = vunpack.c.h.bf16 %v23_v16  ;;  %v391_v26 = vld [vmem:[%s541_s1 + $0x10] sm:$0xff]  ;;  %v390_v32 = vld [vmem:[%s541_s1 + $0x8] sm:$0xff]  ;;  %v389_v38 = vld [vmem:[%s541_s1] sm:$0xff] }
   0x8   :  { %274 = vmatpush.bf16.msra.mxu2 %v411_v7  ;;  %v399_v27 = vld [vmem:[%s541_s1 + $0x50] sm:$0xff]  ;;  %v32_v28 = vadd.f32 %v28_v18, %v24_v17  ;;  %v33_v30 = vadd.f32 %v29_v20, %v25_v19  ;;  %v398_v33 = vld [vmem:[%s541_s1 + $0x48] sm:$0xff]  ;;  %v397_v39 = vld [vmem:[%s541_s1 + $0x40] sm:$0xff] }
   0x9   :  { %v34_v29 = vadd.f32 %v30_v23, %v26_v22  ;;  %v35_v31 = vadd.f32 %v31_v25, %v27_v24  ;;  %v408_v42 = vld [vmem:[%s542_s3 + $0x18] sm:$0xff]  ;;  %v407_v43 = vld [vmem:[%s542_s3 + $0x10] sm:$0xff]  ;;  %v406_v44 = vld [vmem:[%s542_s3 + $0x8] sm:$0xff] }
   0xa   :  { %176 = vmatpush.bf16.msra.mxu0 %v394_v4  ;;  %v36_v34 = vmul.f32 0.5, %v32_v28  ;;  %v37_v36 = vmul.f32 0.5, %v33_v30  ;;  %v405_v45 = vld [vmem:[%s542_s3] sm:$0xff] }
   0xb   :  { %190 = vmatpush.bf16.msra.mxu1 %v402_v5  ;;  %v38_v35 = vmul.f32 0.5, %v34_v29  ;;  %v39_v37 = vmul.f32 0.5, %v35_v31  ;;  %v413_v48 = vld [vmem:[%s543_s2] ss:$0 sm:$0xff] }
   0xc   :  { %275 = vmatpush.bf16.msra.mxu2 %v410_v10  ;;  %v414_v58 = vld [vmem:[%s545_s4] ss:$0 sm:$0xff] }
   0xd   :  { %v40_v40 = vpack.c.bf16 %v38_v35, %v36_v34  ;;  %v41_v41 = vpack.c.bf16 %v39_v37, %v37_v36 }
   0xe   :  { %177 = vmatpush.bf16.msra.mxu0 %v393_v8 }
   0xf   :  { %191 = vmatpush.bf16.msra.mxu1 %v401_v9 }
  0x10   :  { %276 = vmatpush.bf16.msra.mxu2 %v409_v21 }
  0x12   :  { %178 = vmatpush.bf16.msra.mxu0 %v392_v11 }
  0x13   :  { %192 = vmatpush.bf16.msra.mxu1 %v400_v14 }
  0x14   :  { %277 = vmatpush.bf16.msra.mxu2 %v408_v42 }
  0x16   :  { %179 = vmatpush.bf16.msra.mxu0 %v391_v26 }
  0x17   :  { %193 = vmatpush.bf16.msra.mxu1 %v399_v27 }
  0x18   :  { %278 = vmatpush.bf16.msra.mxu2 %v407_v43 }
  0x1a   :  { %180 = vmatpush.bf16.msra.mxu0 %v390_v32 }
  0x1b   :  { %194 = vmatpush.bf16.msra.mxu1 %v398_v33 }
  0x1c   :  { %279 = vmatpush.bf16.msra.mxu2 %v406_v44 }
  0x1e   :  { %181 = vmatpush.bf16.msra.mxu0 %v389_v38 }
  0x1f   :  { %195 = vmatpush.bf16.msra.mxu1 %v397_v39 }
  0x20   :  { %280 = vmatpush.bf16.msra.mxu2 %v405_v45 }
  0x21   :  { %182 = vmatmul.bf16.vlgmr.msra.gmra.mxu0 %v40_v40 }
  0x22   :  { %196 = vmatmul.bf16.vlgmr.msra.gmra.mxu1 %v41_v41 }
  0x9e   :  { %v183_v46 = vpop.f32.mrf.mxu0 }
  0x9f   :  { %v197_v47 = vpop.f32.mrf.mxu1  ;;  %v184_v49 = vadd.f32 %v413_v48, %v183_v46 }
  0xa1   :  { %v198_v51 = vadd.f32 %v197_v47, %v184_v49 }
  0xa3   :  { %v202_v55 = vmax.f32 %v198_v51, 0.0 }
  0xa6   :  { %v185_v50 = vpop.f32.mrf.mxu0 }
  0xa7   :  { %v186_v52 = vadd.f32 %v413_v48, %v185_v50  ;;  %v199_v53 = vpop.f32.mrf.mxu1 }
  0xa9   :  { %v200_v54 = vadd.f32 %v199_v53, %v186_v52 }
  0xab   :  { %v203_v56 = vmax.f32 %v200_v54, 0.0 }
  0xad   :  { %v204_v57 = vpack.c.bf16 %v203_v56, %v202_v55 }
  0xaf   :  { %281 = vmatmul.bf16.vlgmr.msra.gmra.mxu2 %v204_v57 }
 0x132   :  { %v282_v59 = vpop.f32.mrf.mxu2 }
 0x133   :  { %v283_v60 = vadd.f32 %v414_v58, %v282_v59 }
 0x135   :  { %287 = vst [vmem:[%s546_s5] sm:$0xff] %v283_v60 }
 0x13a   :  { %v284_v61 = vpop.f32.mrf.mxu2 }
 0x13b   :  { %v285_v62 = vadd.f32 %v414_v58, %v284_v61 }
 0x13d   :  { %288 = vst [vmem:[%s546_s5 + $0x8] sm:$0xff] %v285_v62 }

</bundles_post_ra>
